<compile_context>
chip_gen: v5e
topology: v5e:2x2
jax: 0.10.0
libtpu: 0.0.40
codegen_flags: <defaults>
</compile_context>

<pallas_src>
import dataclasses

import jax
import jax.numpy as jnp
from jax.experimental import pallas as pl
from jax.experimental.pallas import tpu as pltpu

LANE = 128


# ----------------------------------------------------------------------------- helpers
def _round_up(n, m=LANE):
    return ((n + m - 1) // m) * m


def _pad_axis(a, axis, target):
    pad = [(0, 0)] * a.ndim
    pad[axis] = (0, target - a.shape[axis])
    return jnp.pad(a, pad)


# ----------------------------------------------------------------------------- kernels
def fused_stem_pool_fc_kernel(patches_ref, pool_ref, wf_ref, bf_ref, o_ref):
    """conv3x3+BN -> global avg pool -> fc, algebraically folded.

    patches_ref: (Bblk, HW, Kp)    im2col patches, K = 9*Cin zero-padded to 128 lanes
    pool_ref:    (Bblk, Bblk*HW)   block-diagonal 1/HW pooling matrix (MXU reduce)
    wf_ref:      (Kp, Np)          W_fused = (im2col(conv_w)*bn_scale) @ fc_w
    bf_ref:      (1, Np)           b_fused = bn_shift @ fc_w + fc_b
    o_ref:       (1, Bblk, Np)
    """
    b_blk, hw, kp = patches_ref.shape
    pm = patches_ref[...].reshape(b_blk * hw, kp)                 # collapse leading dims (no-op)
    pooled = jnp.dot(pool_ref[...], pm,
                     preferred_element_type=jnp.float32)          # (Bblk, Kp)  spatial mean on MXU
    logits = jnp.dot(pooled, wf_ref[...],
                     preferred_element_type=jnp.float32) + bf_ref[...]
    o_ref[...] = logits.reshape(o_ref.shape).astype(o_ref.dtype)


def aux_head_kernel(x_ref, pool_ref, w1_ref, t1_ref, w2_ref, t2_ref, wl_ref, bl_ref,
                    o_ref):
    """AuxiliaryHead (input_size=8): ReLU -> AvgPool(5, stride 3) -> 1x1 conv(128)
       -> BN -> ReLU -> 2x2 conv(768) -> BN -> ReLU -> flatten -> Linear.

    x_ref: (1, 8, 8, Cp=128)    pool_ref: (4, 64)  (1/25 folded)
    w1_ref: (Cp, 128)           t1: (1, 128)       (BN1 scale folded into w1)
    w2_ref: (4, 128, 768)       t2: (1, 768)       (BN2 scale folded into w2)
    wl_ref: (768, Np)           bl: (1, Np)        o_ref: (1, 1, Np)
    """
    _, s, _, cp = x_ref.shape
    x = jnp.maximum(x_ref[...], 0.0).reshape(s * s, cp)           # ReLU, (64, Cp)
    p = jnp.dot(pool_ref[...], x,
                preferred_element_type=jnp.float32)               # (4, Cp)  avg-pool as matmul
    h1 = jnp.dot(p, w1_ref[...],
                 preferred_element_type=jnp.float32) + t1_ref[...]
    h1 = jnp.maximum(h1, 0.0)                                     # (4, 128)

    # 2x2 conv on the 2x2 map == sum of 4 (1,128)x(128,768) dots (no (1,512) relayout).
    w2 = w2_ref[...]
    acc = t2_ref[...]
    for k in range(4):
        acc = acc + jnp.dot(h1[k:k + 1, :], w2[k],
                            preferred_element_type=jnp.float32)
    h2 = jnp.maximum(acc, 0.0)                                    # (1, 768)

    logits = jnp.dot(h2, wl_ref[...],
                     preferred_element_type=jnp.float32) + bl_ref[...]
    o_ref[...] = logits.reshape(o_ref.shape).astype(o_ref.dtype)


# ----------------------------------------------------------------------------- wrappers
def darts_like_forward(fp, x_nchw, n_classes):
    """DARTSLikeNet.forward, fused into a single pallas_call."""
    x = jnp.transpose(x_nchw, (0, 2, 3, 1)).astype(jnp.float32)   # NCHW -> NHWC
    B, H, W, Cin = x.shape
    HW = H * W
    kp, np_ = fp["w_fused"].shape

    # TODO(synk): cell loop skipped (cell_cls / cell_kwargs are undefined injected
    # dependencies); with zero cells `s0, s1 = s1, cell((s0, s1))` is a no-op.

    # Wrapper-side im2col (XLA): lane-dense (B, HW, Kp=128) kernel input.
    # Tap order (kh, kw, cin) matches conv_w.reshape(9*Cin, Cout).
    xp = jnp.pad(x, ((0, 0), (1, 1), (1, 1), (0, 0)))
    taps = [xp[:, kh:kh + H, kw:kw + W, :] for kh in range(3) for kw in range(3)]
    patches = jnp.concatenate(taps, axis=-1).reshape(B, HW, 9 * Cin)
    patches = _pad_axis(patches, 2, kp)

    # 2 grid steps of B/2 images when possible (both v7x TensorCores); on 1-TC
    # chips the extra step costs ~0.35us only.
    num_blocks = 2 if (B >= 2 and B % 2 == 0) else 1
    b_blk = B // num_blocks

    # Block-diagonal mean-pooling matrix: spatial reduce runs on the MXU, not XLU.
    row = jnp.arange(b_blk, dtype=jnp.int32)[:, None]
    col = jnp.arange(b_blk * HW, dtype=jnp.int32)[None, :]
    pool = jnp.where(col // HW == row, 1.0 / HW, 0.0).astype(jnp.float32)

    args = (patches, pool, fp["w_fused"], fp["b_fused"])
    flops = 2 * B * (b_blk * HW) * kp + 2 * B * kp * np_
    bytes_accessed = sum(int(a.size) * a.dtype.itemsize for a in args) + B * np_ * 4

    out = pl.pallas_call(
        fused_stem_pool_fc_kernel,
        grid=(num_blocks,),
        in_specs=[
            pl.BlockSpec((b_blk, HW, kp), lambda b: (b, 0, 0)),
            # Constant index maps: weights stay resident in VMEM across grid steps.
            pl.BlockSpec(pool.shape, lambda b: (0, 0)),
            pl.BlockSpec(fp["w_fused"].shape, lambda b: (0, 0)),
            pl.BlockSpec(fp["b_fused"].shape, lambda b: (0, 0)),
        ],
        out_specs=pl.BlockSpec((1, b_blk, np_), lambda b: (b, 0, 0)),
        out_shape=jax.ShapeDtypeStruct((num_blocks, b_blk, np_), jnp.float32),
        compiler_params=pltpu.CompilerParams(dimension_semantics=("parallel",)),
        cost_estimate=pl.CostEstimate(flops=flops, transcendentals=0,
                                      bytes_accessed=bytes_accessed),
    )(*args)
    return out.reshape(B, np_)[:, :n_classes]


def aux_head_forward(fp, x_nhwc, n_classes):
    B, S, _, C = x_nhwc.shape
    cp = fp["aux_w1"].shape[0]
    np_ = fp["aux_fc_w"].shape[-1]
    x = _pad_axis(x_nhwc.astype(jnp.float32), 3, cp)              # lane-dense channels
    args = (x, fp["aux_pool"], fp["aux_w1"], fp["aux_t1"], fp["aux_w2"],
            fp["aux_t2"], fp["aux_fc_w"], fp["aux_fc_b"])

    flops = 2 * B * (4 * S * S * cp + 4 * cp * 128 + 4 * 128 * 768 + 768 * np_)
    bytes_accessed = sum(int(a.size) * a.dtype.itemsize for a in args) + B * np_ * 4

    out = pl.pallas_call(
        aux_head_kernel,
        grid=(B,),
        in_specs=[
            pl.BlockSpec((1, S, S, cp), lambda b: (b, 0, 0, 0)),
            pl.BlockSpec(fp["aux_pool"].shape, lambda b: (0, 0)),
            pl.BlockSpec(fp["aux_w1"].shape, lambda b: (0, 0)),
            pl.BlockSpec(fp["aux_t1"].shape, lambda b: (0, 0)),
            pl.BlockSpec(fp["aux_w2"].shape, lambda b: (0, 0, 0)),
            pl.BlockSpec(fp["aux_t2"].shape, lambda b: (0, 0)),
            pl.BlockSpec(fp["aux_fc_w"].shape, lambda b: (0, 0)),
            pl.BlockSpec(fp["aux_fc_b"].shape, lambda b: (0, 0)),
        ],
        out_specs=pl.BlockSpec((1, 1, np_), lambda b: (b, 0, 0)),
        out_shape=jax.ShapeDtypeStruct((B, 1, np_), jnp.float32),
        compiler_params=pltpu.CompilerParams(dimension_semantics=("parallel",)),
        cost_estimate=pl.CostEstimate(flops=flops, transcendentals=0,
                                      bytes_accessed=bytes_accessed),
    )(*args)
    return out[:, 0, :n_classes]


# ----------------------------------------------------------------------------- params
@dataclasses.dataclass
class Config:
    channel_in: int = 4
    channel_init: int = 4
    channel_multiplier: int = 3
    classes: int = 10
    inputs_model: int = 1
    inputs_layer: int = 2
    inputs_node: int = 1
    nodes: int = 4
    auxiliary: bool = False
    augment: bool = False


def init_params(key, cfg):
    chn_cur = cfg.channel_init * cfg.channel_multiplier     # 12
    chn_p = chn_cur                                          # no cells translated
    ks = jax.random.split(key, 12)
    eps = 1e-5

    def bn_fold(k, c):
        kg, kb = jax.random.split(k)
        gamma = 1.0 + 0.1 * jax.random.normal(kg, (1, c), jnp.float32)
        beta = 0.1 * jax.random.normal(kb, (1, c), jnp.float32)
        mean = jnp.zeros((1, c), jnp.float32)
        var = jnp.ones((1, c), jnp.float32)
        scale = gamma / jnp.sqrt(var + eps)
        return scale, beta - mean * scale

    bn1_scale, bn1_shift = bn_fold(ks[1], chn_cur)
    aux_s1, aux_t1 = bn_fold(ks[6], 128)
    aux_s2, aux_t2 = bn_fold(ks[8], 768)
    return dict(
        conv_w=0.1 * jax.random.normal(ks[0], (3, 3, cfg.channel_in, chn_cur), jnp.float32),
        bn1_scale=bn1_scale, bn1_shift=bn1_shift,
        fc_w=0.1 * jax.random.normal(ks[2], (chn_p, cfg.classes), jnp.float32),
        fc_b=0.01 * jax.random.normal(ks[3], (1, cfg.classes), jnp.float32),
        # AuxiliaryHead(input_size=8, C=chn_p, n_classes)
        aux_w1=0.1 * jax.random.normal(ks[5], (chn_p, 128), jnp.float32),
        aux_s1=aux_s1, aux_t1=aux_t1,
        aux_w2=0.1 * jax.random.normal(ks[7], (2, 2, 128, 768), jnp.float32),
        aux_s2=aux_s2, aux_t2=aux_t2,
        aux_fc_w=0.1 * jax.random.normal(ks[9], (768, cfg.classes), jnp.float32),
        aux_fc_b=0.01 * jax.random.normal(ks[10], (1, cfg.classes), jnp.float32),
    )


def fold_params(p):
    """One-time kernel-friendly parameter prep.

    Main path: fold BN scale into the conv weight, then algebraically fold
    conv -> global-avg-pool -> fc (all linear, cell stack empty):
        W_fused = im2col(conv_w * bn_scale) @ fc_w,   b_fused = bn_shift @ fc_w + fc_b
    Aux head: build the AvgPool(5,3) pooling matrix (1/25 folded), fold BN scales
    into the 1x1 / 2x2 conv weights, pad channel/class dims to 128 lanes.
    """
    hi = jax.lax.Precision.HIGHEST
    conv_w = p["conv_w"] * p["bn1_scale"][0]                    # (3,3,Cin,Cout)
    kh, kw, cin, cout = conv_w.shape
    ncls = p["fc_w"].shape[-1]
    kp = _round_up(kh * kw * cin)                               # 36  -> 128
    np_ = _round_up(ncls)                                       # 10  -> 128

    w2col = conv_w.reshape(kh * kw * cin, cout)                 # (36, Cout), (kh,kw,cin) order
    w_fused = jnp.dot(w2col, p["fc_w"], precision=hi)           # (36, ncls)
    b_fused = jnp.dot(p["bn1_shift"], p["fc_w"], precision=hi) + p["fc_b"]
    w_fused = _pad_axis(_pad_axis(w_fused, 0, kp), 1, np_)      # (Kp, Np)
    b_fused = _pad_axis(b_fused, 1, np_)                        # (1, Np)

    # AuxiliaryHead: AvgPool2d(5, stride 3) on 8x8 -> 4 windows; 1/25 folded in.
    idx = jnp.arange(64)
    hh, ww = idx // 8, idx % 8
    rows = []
    for oh in range(2):
        for ow in range(2):
            rows.append((hh >= oh * 3) & (hh < oh * 3 + 5) &
                        (ww >= ow * 3) & (ww < ow * 3 + 5))
    aux_pool = jnp.stack(rows).astype(jnp.float32) / 25.0       # (4, 64)

    cp = _round_up(p["aux_w1"].shape[0])                        # 12 -> 128
    aux_w1 = _pad_axis(p["aux_w1"] * p["aux_s1"][0], 0, cp)     # (Cp, 128), BN1 scale folded
    aux_w2 = (p["aux_w2"] * p["aux_s2"][0]).reshape(4, 128, 768)  # BN2 scale folded
    aux_fc_w = _pad_axis(p["aux_fc_w"], 1, np_)
    aux_fc_b = _pad_axis(p["aux_fc_b"], 1, np_)

    return dict(w_fused=w_fused, b_fused=b_fused,
                aux_pool=aux_pool, aux_w1=aux_w1, aux_t1=p["aux_t1"],
                aux_w2=aux_w2, aux_t2=p["aux_t2"],
                aux_fc_w=aux_fc_w, aux_fc_b=aux_fc_b)


# ----------------------------------------------------------------------------- pure-JAX references
def ref_forward(p, x_nchw):
    x = jnp.transpose(x_nchw, (0, 2, 3, 1))
    y = jax.lax.conv_general_dilated(x, p["conv_w"], (1, 1), "SAME",
                                     dimension_numbers=("NHWC", "HWIO", "NHWC"),
                                     precision=jax.lax.Precision.HIGHEST)
    y = y * p["bn1_scale"] + p["bn1_shift"]
    pooled = jnp.mean(y, axis=(1, 2))
    return jnp.dot(pooled, p["fc_w"], precision=jax.lax.Precision.HIGHEST) + p["fc_b"]


def ref_aux_head(p, x_nhwc):
    x = jax.nn.relu(x_nhwc)
    pooled = jax.lax.reduce_window(x, 0.0, jax.lax.add, (1, 5, 5, 1), (1, 3, 3, 1),
                                   "VALID") / 25.0
    h = jax.lax.conv_general_dilated(pooled, p["aux_w1"][None, None], (1, 1), "VALID",
                                     dimension_numbers=("NHWC", "HWIO", "NHWC"),
                                     precision=jax.lax.Precision.HIGHEST)
    h = jax.nn.relu(h * p["aux_s1"] + p["aux_t1"])
    h = jax.lax.conv_general_dilated(h, p["aux_w2"], (1, 1), "VALID",
                                     dimension_numbers=("NHWC", "HWIO", "NHWC"),
                                     precision=jax.lax.Precision.HIGHEST)
    h = jax.nn.relu(h * p["aux_s2"] + p["aux_t2"])
    h = h.reshape(h.shape[0], -1)
    return jnp.dot(h, p["aux_fc_w"], precision=jax.lax.Precision.HIGHEST) + p["aux_fc_b"]


# ----------------------------------------------------------------------------- main
if __name__ == "__main__":
    cfg = Config()
    key = jax.random.PRNGKey(0)
    k_params, k_x, k_aux = jax.random.split(key, 3)
    params = init_params(k_params, cfg)
    fparams = fold_params(params)

    # Main forward: x in PyTorch NCHW layout (B=2, C_in=4, H=W=16).
    x = jax.random.normal(k_x, (2, cfg.channel_in, 16, 16), jnp.float32)
    y = darts_like_forward(fparams, x, cfg.classes)
    jax.block_until_ready(y)
    assert y.shape == (2, cfg.classes)
    y_ref = ref_forward(params, x)
    assert jnp.allclose(y, y_ref, rtol=2e-3, atol=2e-3), "main path mismatch"

    # AuxiliaryHead demo (8x8 feature map with chn_p channels, as at aux_pos).
    chn_p = cfg.channel_init * cfg.channel_multiplier
    x_aux = jax.random.normal(k_aux, (2, 8, 8, chn_p), jnp.float32)
    aux_logits = aux_head_forward(fparams, x_aux, cfg.classes)
    jax.block_until_ready(aux_logits)
    assert aux_logits.shape == (2, cfg.classes)
    aux_ref = ref_aux_head(params, x_aux)
    assert jnp.allclose(aux_logits, aux_ref, rtol=2e-3, atol=2e-3), "aux head mismatch"

    assert bool(jnp.all(jnp.isfinite(y))) and bool(jnp.all(jnp.isfinite(aux_logits)))
    print("KERNEL_OK")
</pallas_src>

<mosaic_0001>
module attributes {stable_mosaic.version = 11 : i64} {
  func.func @fused_stem_pool_fc_kernel(%arg0: i32, %arg1: memref<1x256x128xf32, #tpu.memory_space<vmem>>, %arg2: memref<1x256xf32, #tpu.memory_space<vmem>>, %arg3: memref<128x128xf32, #tpu.memory_space<vmem>>, %arg4: memref<1x128xf32, #tpu.memory_space<vmem>>, %arg5: memref<1x1x128xf32, #tpu.memory_space<vmem>>) attributes {dimension_semantics = [#tpu.dimension_semantics<parallel>], iteration_bounds = array<i64: 2>, scalar_prefetch = 0 : i64, scratch_operands = 0 : i64, tpu.core_type = #tpu.core_type<tc>, window_params = [{transform_indices = @transform_0, window_bounds = array<i64: 1, 256, 128>}, {pipeline_mode = #tpu.pipeline_mode<synchronous>, transform_indices = @transform_1, window_bounds = array<i64: 1, 256>}, {pipeline_mode = #tpu.pipeline_mode<synchronous>, transform_indices = @transform_2, window_bounds = array<i64: 128, 128>}, {pipeline_mode = #tpu.pipeline_mode<synchronous>, transform_indices = @transform_3, window_bounds = array<i64: 1, 128>}, {transform_indices = @transform_4, window_bounds = array<i64: 1, 1, 128>}]} {
    %c0 = arith.constant 0 : index
    %c0_0 = arith.constant 0 : index
    %c0_1 = arith.constant 0 : index
    %0 = vector.load %arg1[%c0, %c0_0, %c0_1] : memref<1x256x128xf32, #tpu.memory_space<vmem>>, vector<1x256x128xf32>
    %1 = vector.shape_cast %0 : vector<1x256x128xf32> to vector<256x128xf32>
    %c0_2 = arith.constant 0 : index
    %c0_3 = arith.constant 0 : index
    %2 = vector.load %arg2[%c0_2, %c0_3] : memref<1x256xf32, #tpu.memory_space<vmem>>, vector<1x256xf32>
    %cst = arith.constant dense<0.000000e+00> : vector<1x128xf32>
    %3 = tpu.matmul %2, %1, %cst {dimension_numbers = #tpu.dot_dimension_numbers<[1], [0], [0], [1], [0, 0, 1, 1], [], []>} : vector<1x256xf32>, vector<256x128xf32>, vector<1x128xf32> -> vector<1x128xf32>
    %c0_4 = arith.constant 0 : index
    %c0_5 = arith.constant 0 : index
    %4 = vector.load %arg3[%c0_4, %c0_5] : memref<128x128xf32, #tpu.memory_space<vmem>>, vector<128x128xf32>
    %cst_6 = arith.constant dense<0.000000e+00> : vector<1x128xf32>
    %5 = tpu.matmul %3, %4, %cst_6 {dimension_numbers = #tpu.dot_dimension_numbers<[1], [0], [0], [1], [0, 0, 1, 1], [], []>} : vector<1x128xf32>, vector<128x128xf32>, vector<1x128xf32> -> vector<1x128xf32>
    %c0_7 = arith.constant 0 : index
    %c0_8 = arith.constant 0 : index
    %6 = vector.load %arg4[%c0_7, %c0_8] : memref<1x128xf32, #tpu.memory_space<vmem>>, vector<1x128xf32>
    %7 = arith.addf %5, %6 : vector<1x128xf32>
    %8 = vector.shape_cast %7 : vector<1x128xf32> to vector<1x1x128xf32>
    %c0_9 = arith.constant 0 : index
    %c0_10 = arith.constant 0 : index
    %c0_11 = arith.constant 0 : index
    %9 = vector.load %arg5[%c0_9, %c0_10, %c0_11] : memref<1x1x128xf32, #tpu.memory_space<vmem>>, vector<1x1x128xf32>
    tpu.vector_store %arg5[%c0_9, %c0_10, %c0_11], %8 {strides = array<i32>} : memref<1x1x128xf32, #tpu.memory_space<vmem>>, vector<1x1x128xf32>,
    return
  }
  func.func @transform_0(%arg0: i32) -> (i32, i32, i32) {
    %c0_i32 = arith.constant 0 : i32
    %c0_i32_0 = arith.constant 0 : i32
    %c0_i32_1 = arith.constant 0 : i32
    return %arg0, %c0_i32, %c0_i32_0 : i32, i32, i32
  }
  func.func @transform_1(%arg0: i32) -> (i32, i32) {
    %c0_i32 = arith.constant 0 : i32
    %c0_i32_0 = arith.constant 0 : i32
    %c0_i32_1 = arith.constant 0 : i32
    return %c0_i32, %c0_i32_0 : i32, i32
  }
  func.func @transform_2(%arg0: i32) -> (i32, i32) {
    %c0_i32 = arith.constant 0 : i32
    %c0_i32_0 = arith.constant 0 : i32
    %c0_i32_1 = arith.constant 0 : i32
    return %c0_i32, %c0_i32_0 : i32, i32
  }
  func.func @transform_3(%arg0: i32) -> (i32, i32) {
    %c0_i32 = arith.constant 0 : i32
    %c0_i32_0 = arith.constant 0 : i32
    %c0_i32_1 = arith.constant 0 : i32
    return %c0_i32, %c0_i32_0 : i32, i32
  }
  func.func @transform_4(%arg0: i32) -> (i32, i32, i32) {
    %c0_i32 = arith.constant 0 : i32
    %c0_i32_0 = arith.constant 0 : i32
    %c0_i32_1 = arith.constant 0 : i32
    return %arg0, %c0_i32, %c0_i32_0 : i32, i32, i32
  }
}

</mosaic_0001>

<bundles_post_ra>
// kernel: tpu_custom_call.1
= control target key start
LH: loop header
LB: loop body
LE: loop exit
PB: predicated region body
PF: predicated region fallthrough
CT: control target
= control target key end

     0   :  { %s920_s0 = inlined_call_operand.hbm [shape: f32[2,256,128], index: 0, kind: input, shape index: {}]   ;;  %s921_s1 = inlined_call_operand.hbm [shape: f32[1,256], index: 1, kind: input, shape index: {}]   ;;  %s922_s2 = inlined_call_operand.hbm [shape: f32[128,128], index: 2, kind: input, shape index: {}]   ;;  %s923_s3 = inlined_call_operand.vmem [shape: f32[1,128], index: 3, kind: input, shape index: {}]   ;;  %s924_s4 = inlined_call_operand.hbm [shape: f32[2,1,128], index: 4, kind: output, shape index: {}]  }
   0x1   :  { %925 = sst [smem:[#allocation13_spill]] %s921_s1 }
   0x2   :  { %926 = sst [smem:[#allocation14_spill]] %s922_s2 }
   0x3   :  { %9 = vsyncpa [#allocation3], 0 }
   0x4   :  { %11 = vsyncpa [#allocation3 + $0x1], 0 }
   0x5   :  { %12 = vsyncpa [#allocation6], 0 }
   0x6   :  { %13 = vsyncpa [#allocation4], 0 }
   0x7   :  { %15 = vsyncpa [#allocation4 + $0x1], 0  ;;  %s737_s15 = smov 0   ;;  %s739_s16 = smov 0  }
   0x8   :  { %s741_s17 = smov 0   ;;  %s743_s18 = smov 0  }
   0x9 LB: > { %s758_s19 = sadd.s32 4294967295, %s706_s18   ;;  %s462_s20 = sadd.s32 4294967294, %s706_s18   ;;  %s706_s18 = sphi %s743_s18, %s941_s18   ;;  %s702_s17 = sphi %s741_s17, %s940_s17   ;;  %s698_s16 = sphi %s739_s16, %s939_s16   ;;  %s694_s15 = sphi %s737_s15, %s938_s15  }
   0xa   : > { %s762_s21 = sadd.s32 1, %s706_s18   ;;  %s28_s22 = sadd.s32 1, %s702_s17 }
   0xb   : > { %s25_s23 = ssub.s32 %s706_s18, %s762_s21  ;;  %p35_p0 = scmp.ne.s32.totalorder %s702_s17, %s698_s16 }
   0xc   : > { %p26_p1 = scmp.eq.s32.totalorder %s25_s23, 0  ;;  %p36_p2 = scmp.eq.s32.totalorder %s706_s18, 0 }
   0xd   : > { %p41_p3 = scmp.ne.s32.totalorder %s698_s16, %s694_s15  ;;  %p42_p4 = scmp.eq.s32.totalorder %s758_s19, 0 }
   0xe   : > { %s774_s24 = scalar_select %p26_p1, %s702_s17, %s28_s22  }
   0xf   : > { %p776_p5 = por %p36_p2, %p35_p0  ;;  %p782_p6 = por %p42_p4, %p41_p3 }
  0x10   : > { %927 = sst [smem:[#allocation12_spill]] %s774_s24  ;;  %p128_p7 = scmp.eq.s32.totalorder %s758_s19, 1 }
  0x11   : > { %p134_p8 = scmp.eq.s32.totalorder %s462_s20, 1  ;;  %p463_p9 = scmp.ge.s32.totalorder %s706_s18, 1 }
  0x12   : > { %p141_p10 = scmp.lt.s32.totalorder %s706_s18, 3  ;;  %p789_p11 = por %p128_p7, %p35_p0 }
  0x13   : > { %p793_p12 = por %p134_p8, %p41_p3  ;;  %s933_s1 = sld [smem:[#allocation13_spill]] }
  0x14   : > { %p797_p13 = pnand %p463_p9, %p141_p10  ;;  %s708_s7 = smov [#allocation5]  }
  0x15   : > { %s155_s8 = sshll.u32 %s708_s7, 4  ;;  %p506_p3 = scmp.lt.s32.totalorder %s706_s18, 2  ;;  %s156_s8 = int_to_ptr.vmem [resolvable:$true] %s155_s8 }
  0x16   : > { %p489_p1 = pneg %p797_p13  ;;  %s934_s2 = sld [smem:[#allocation14_spill]] }
  0x17   : > { %p815_p7 = pnand %p506_p3, %p776_p5  ;;  %s709_s13 = smov [#allocation7]  }
  0x18   : > { %p490_p2 = pnand %p489_p1, %p42_p4  ;;  %s166_s14 = sshll.u32 %s709_s13, 4  ;;  %s167_s14 = int_to_ptr.vmem [resolvable:$true] %s166_s14 }
  0x19   : > { %s153_s6 = sshll.u32 %s933_s1, 4  ;;  %s183_s20 = sand.u32 1, %s702_s17   ;;  %s154_s6 = int_to_ptr.hbm [resolvable:$true] %s153_s6 }
  0x1a   : > { %492 = dma.hbm_to_vmem [thread:$0]  (!%p490_p2), %s154_s6, 32, %s156_s8, [#allocation6]  }
  0x1b   : > { %s710_s22 = smov 128   ;;  %s711_s23 = smov 8  }
  0x1c   : > { %s164_s11 = sshll.u32 %s934_s2, 4  ;;  %s467_s30 = sshll.u32 %s183_s20, 8  ;;  %s165_s11 = int_to_ptr.hbm [resolvable:$true] %s164_s11 }
  0x1d   : > { %495 = dma.hbm_to_vmem [thread:$0]  (!%p490_p2), %s165_s11, 2048, %s167_s14, [#allocation6], %s710_s22, %s710_s22, %s711_s23  }
  0x1e   : > { %s476_s5 = sshll.u32 %s706_s18, 8  ;;  %s187_s6 = scalar_lea.vmem [#allocation2], %s467_s30 }
  0x1f   : > { %s192_s10 = scalar_lea.hbm %s920_s0, %s476_s5  ;;  %s195_s25 = sshll.u32 %s187_s6, 4  ;;  %s196_s25 = int_to_ptr.vmem [resolvable:$true] %s195_s25 }
  0x20   : > { %s193_s8 = sshll.u32 %s192_s10, 4  ;;  %s184_s1 = scalar_lea.sflag [#allocation3], %s183_s20  ;;  %s194_s8 = int_to_ptr.hbm [resolvable:$true] %s193_s8 }
  0x21   : > { %s606_s2 = sshra.s32 %s194_s8, 4  ;;  %p610_p8 = pneg %p815_p7  ;;  %s607_s2 = int_to_ptr.hbm [resolvable:$true] %s606_s2 }
  0x22   : > { %s608_s13 = scalar_lea.hbm %s607_s2, 256  ;;  %s613_s24 = scalar_lea.hbm %s920_s0, 512 }
  0x23   : > { %p609_p5 = scmp.ne.s32.totalorder %s607_s2, %s608_s13  ;;  %p614_p1 = scmp.lt.s32.totalorder %s607_s2, %s920_s0 }
  0x24   : > { %p615_p2 = scmp.lt.s32.totalorder %s613_s24, %s608_s13 }
  0x25   : > { %p611_p9 = pnand %p610_p8, %p609_p5 }
  0x26   : > { %p616_p3 = por %p615_p2, %p614_p1 }
  0x27   : > { %p612_p10 = pneg %p611_p9 }
  0x29   : > { %p617_p0 = pnand %p616_p3, %p612_p10 }
  0x2b   : > { %620 = shalt.err (!%p617_p0)
}
  0x2c   : > { %499 = dma.hbm_to_vmem [thread:$0]  (!%p815_p7), %s194_s8, 4096, %s196_s25, %s184_s1, %s710_s22, %s710_s22, %s711_s23  }
  0x2d   : > { %207 = sbr.rel (%p797_p13) target bundleno = 351 (0x15f), region = 36  ;;  %s837_s20 = sand.u32 (!%p797_p13), 1, %s698_s16  }
  0x2e   : > { %s471_s30 = sshll.u32 (!%p797_p13), %s837_s20, 8  ;;  %s210_s9 = scalar_lea.sflag (!%p797_p13), [#allocation3], %s837_s20 }
  0x2f   : > { %s841_s10 = scalar_lea.vmem (!%p797_p13), [#allocation2], %s471_s30 }
  0x32   : > { %681 = dma.done.wait (%p782_p6), %s210_s9, 4096  }
  0x33   : > { %683 = vsyncadd (%p782_p6), %s210_s9, 4294963200 }
  0x34   : > { %685 = dma.done.wait (%p42_p4), [#allocation6], 2080  }
  0x35   : > { %687 = vsyncadd (%p42_p4), [#allocation6], 4294965216  ;;  %v263_v0 = vld [vmem:[%s841_s10 + $0x78] sm:$0xff]  ;;  %v262_v2 = vld [vmem:[%s841_s10 + $0x70] sm:$0xff]  ;;  %s373_s24 = scalar_lea.hbm %s924_s4, %s758_s19  ;;  %s247_s12 = scalar_lea.vmem [#allocation8], %s837_s20 }
  0x36   : > { %v279_v1 = vld [vmem:[%s841_s10 + $0xf8] sm:$0xff]  ;;  %286 = vmatpush.msra.mxu0 %v263_v0  ;;  %v278_v3 = vld [vmem:[%s841_s10 + $0xf0] sm:$0xff]  ;;  %v261_v4 = vld [vmem:[%s841_s10 + $0x68] sm:$0xff]  ;;  %s375_s22 = sshll.u32 %s247_s12, 4  ;;  %s377_s23 = sshll.u32 %s373_s24, 4  ;;  %s376_s22 = int_to_ptr.vmem [resolvable:$true] %s375_s22  ;;  %s378_s23 = int_to_ptr.hbm [resolvable:$true] %s377_s23 }
  0x37   : > { %306 = vmatpush.msra.mxu1 %v279_v1  ;;  %v277_v5 = vld [vmem:[%s841_s10 + $0xe8] sm:$0xff]  ;;  %v260_v6 = vld [vmem:[%s841_s10 + $0x60] sm:$0xff]  ;;  %v259_v8 = vld [vmem:[%s841_s10 + $0x58] sm:$0xff]  ;;  %s365_s6 = scalar_lea.sflag [#allocation4], %s837_s20  ;;  %s650_s25 = sshra.s32 %s378_s23, 4  ;;  %s651_s25 = int_to_ptr.hbm [resolvable:$true] %s650_s25 }
  0x38   : > { %287 = vmatpush.msra.mxu0 %v262_v2  ;;  %v276_v7 = vld [vmem:[%s841_s10 + $0xe0] sm:$0xff]  ;;  %v275_v9 = vld [vmem:[%s841_s10 + $0xd8] sm:$0xff]  ;;  %v258_v10 = vld [vmem:[%s841_s10 + $0x50] sm:$0xff]  ;;  %s652_s8 = scalar_lea.hbm %s651_s25, 1  ;;  %s656_s11 = scalar_lea.hbm %s924_s4, 2 }
  0x39   : > { %307 = vmatpush.msra.mxu1 %v278_v3  ;;  %v274_v11 = vld [vmem:[%s841_s10 + $0xd0] sm:$0xff]  ;;  %v257_v12 = vld [vmem:[%s841_s10 + $0x48] sm:$0xff]  ;;  %v341_v14 = vld [vmem:[#allocation7 + $0x78] sm:$0xff]  ;;  %p653_p4 = scmp.ne.s32.totalorder %s651_s25, %s652_s8  ;;  %p657_p0 = scmp.lt.s32.totalorder %s651_s25, %s924_s4 }
  0x3a   : > { %288 = vmatpush.msra.mxu0 %v261_v4  ;;  %v273_v13 = vld [vmem:[%s841_s10 + $0xc8] sm:$0xff]  ;;  %v340_v15 = vld [vmem:[#allocation7 + $0x70] sm:$0xff]  ;;  %v256_v16 = vld [vmem:[%s841_s10 + $0x40] sm:$0xff]  ;;  %343 = vmatpush.msra.mxu2 %v341_v14  ;;  %p658_p7 = scmp.lt.s32.totalorder %s656_s11, %s652_s8 }
  0x3b   : > { %308 = vmatpush.msra.mxu1 %v277_v5  ;;  %v272_v17 = vld [vmem:[%s841_s10 + $0xc0] sm:$0xff]  ;;  %v339_v18 = vld [vmem:[#allocation7 + $0x68] sm:$0xff]  ;;  %v255_v19 = vld [vmem:[%s841_s10 + $0x38] sm:$0xff]  ;;  %p654_p6 = pnand %p653_p4, %p789_p11 }
  0x3c   : > { %289 = vmatpush.msra.mxu0 %v260_v6  ;;  %v271_v20 = vld [vmem:[%s841_s10 + $0xb8] sm:$0xff]  ;;  %344 = vmatpush.msra.mxu2 %v340_v15  ;;  %v338_v21 = vld [vmem:[#allocation7 + $0x60] sm:$0xff]  ;;  %v254_v22 = vld [vmem:[%s841_s10 + $0x30] sm:$0xff]  ;;  %p659_p5 = por %p658_p7, %p657_p0 }
  0x3d   : > { %309 = vmatpush.msra.mxu1 %v276_v7  ;;  %v270_v23 = vld [vmem:[%s841_s10 + $0xb0] sm:$0xff]  ;;  %v337_v24 = vld [vmem:[#allocation7 + $0x58] sm:$0xff]  ;;  %v253_v25 = vld [vmem:[%s841_s10 + $0x28] sm:$0xff]  ;;  %p655_p13 = pneg %p654_p6 }
  0x3e   : > { %290 = vmatpush.msra.mxu0 %v259_v8  ;;  %345 = vmatpush.msra.mxu2 %v339_v18  ;;  %v269_v26 = vld [vmem:[%s841_s10 + $0xa8] sm:$0xff]  ;;  %v336_v27 = vld [vmem:[#allocation7 + $0x50] sm:$0xff]  ;;  %v252_v28 = vld [vmem:[%s841_s10 + $0x20] sm:$0xff] }
  0x3f   : > { %310 = vmatpush.msra.mxu1 %v275_v9  ;;  %v268_v29 = vld [vmem:[%s841_s10 + $0xa0] sm:$0xff]  ;;  %v335_v30 = vld [vmem:[#allocation7 + $0x48] sm:$0xff]  ;;  %v251_v31 = vld [vmem:[%s841_s10 + $0x18] sm:$0xff]  ;;  %p660_p8 = pnand %p659_p5, %p655_p13 }
  0x40   : > { %291 = vmatpush.msra.mxu0 %v258_v10  ;;  %346 = vmatpush.msra.mxu2 %v338_v21  ;;  %v267_v32 = vld [vmem:[%s841_s10 + $0x98] sm:$0xff]  ;;  %v334_v33 = vld [vmem:[#allocation7 + $0x40] sm:$0xff]  ;;  %v250_v34 = vld [vmem:[%s841_s10 + $0x10] sm:$0xff] }
  0x41   : > { %311 = vmatpush.msra.mxu1 %v274_v11  ;;  %v266_v35 = vld [vmem:[%s841_s10 + $0x90] sm:$0xff]  ;;  %v280_v36 = vld [vmem:[#allocation5] sm:$0x3]  ;;  %v249_v38 = vld [vmem:[%s841_s10 + $0x8] sm:$0xff] }
  0x42   : > { %292 = vmatpush.msra.mxu0 %v257_v12  ;;  %347 = vmatpush.msra.mxu2 %v337_v24  ;;  %v333_v37 = vld [vmem:[#allocation7 + $0x38] sm:$0xff]  ;;  %v265_v39 = vld [vmem:[%s841_s10 + $0x88] sm:$0xff]  ;;  %v332_v40 = vld [vmem:[#allocation7 + $0x30] sm:$0xff]  ;;  %v282_v43 = vperm.slane %v280_v36, 0  ;;  %v283_v44 = vperm.slane %v280_v36, 1 }
  0x43   : > { %312 = vmatpush.msra.mxu1 %v273_v13  ;;  %v248_v41 = vld [vmem:[%s841_s10] sm:$0xff]  ;;  %v331_v45 = vld [vmem:[#allocation7 + $0x28] sm:$0xff]  ;;  %v328_v48 = vld [vmem:[#allocation7 + $0x10] sm:$0xff] }
  0x44   : > { %293 = vmatpush.msra.mxu0 %v256_v16  ;;  %348 = vmatpush.msra.mxu2 %v336_v27  ;;  %v264_v42 = vld [vmem:[%s841_s10 + $0x80] sm:$0xff]  ;;  %v327_v49 = vld [vmem:[#allocation7 + $0x8] sm:$0xff] }
  0x45   : > { %313 = vmatpush.msra.mxu1 %v272_v17  ;;  %v330_v46 = vld [vmem:[#allocation7 + $0x20] sm:$0xff]  ;;  %v329_v47 = vld [vmem:[#allocation7 + $0x18] sm:$0xff] }
  0x46   : > { %294 = vmatpush.msra.mxu0 %v255_v19  ;;  %349 = vmatpush.msra.mxu2 %v335_v30  ;;  %v326_v50 = vld [vmem:[#allocation7] sm:$0xff]  ;;  %v342_v54 = vld [vmem:[%s923_s3] sm:$0x1] }
  0x47   : > { %314 = vmatpush.msra.mxu1 %v271_v20 }
  0x48   : > { %295 = vmatpush.msra.mxu0 %v254_v22  ;;  %350 = vmatpush.msra.mxu2 %v334_v33 }
  0x49   : > { %315 = vmatpush.msra.mxu1 %v270_v23 }
  0x4a   : > { %296 = vmatpush.msra.mxu0 %v253_v25  ;;  %351 = vmatpush.msra.mxu2 %v333_v37 }
  0x4b   : > { %316 = vmatpush.msra.mxu1 %v269_v26 }
  0x4c   : > { %297 = vmatpush.msra.mxu0 %v252_v28  ;;  %352 = vmatpush.msra.mxu2 %v332_v40 }
  0x4d   : > { %317 = vmatpush.msra.mxu1 %v268_v29 }
  0x4e   : > { %298 = vmatpush.msra.mxu0 %v251_v31  ;;  %353 = vmatpush.msra.mxu2 %v331_v45 }
  0x4f   : > { %318 = vmatpush.msra.mxu1 %v267_v32 }
  0x50   : > { %299 = vmatpush.msra.mxu0 %v250_v34  ;;  %354 = vmatpush.msra.mxu2 %v330_v46 }
  0x51   : > { %319 = vmatpush.msra.mxu1 %v266_v35 }
  0x52   : > { %300 = vmatpush.msra.mxu0 %v249_v38  ;;  %355 = vmatpush.msra.mxu2 %v329_v47 }
  0x53   : > { %320 = vmatpush.msra.mxu1 %v265_v39 }
  0x54   : > { %301 = vmatpush.msra.mxu0 %v248_v41  ;;  %356 = vmatpush.msra.mxu2 %v328_v48 }
  0x55   : > { %321 = vmatpush.msra.mxu1 %v264_v42  ;;  %302 = vmatmul.f32.vlgmr.msra.gmra.mxu0 %v282_v43 }
  0x56   : > { %322 = vmatmul.f32.vlgmr.msra.gmra.mxu1 %v283_v44  ;;  %357 = vmatpush.msra.mxu2 %v327_v49 }
  0x58   : > { %358 = vmatpush.msra.mxu2 %v326_v50 }
  0xd2   : > { %v303_v51 = vpop.f32.mrf.mxu0 }
  0xd3   : > { %v323_v52 = vpop.f32.mrf.mxu1 }
  0xd4   : > { %v324_v53 = vadd.f32 %v323_v52, %v303_v51 }
  0xd6   : > { %359 = vmatmul.f32.vlgmr.msra.gmra.mxu2 %v324_v53 }
 0x159   : > { %v360_v55 = vpop.f32.mrf.mxu2 }
 0x15a   : > { %v361_v56 = vadd.f32 %v360_v55, %v342_v54 }
 0x15c   : > { %363 = vst [vmem:[%s247_s12] sm:$0x1] %v361_v56 }
 0x15d   : > { %663 = shalt.err (!%p660_p8)
}
 0x15e   : > { %487 = dma.vmem_to_hbm [thread:$0]  (%p789_p11), %s376_s22, 16, %s378_s23, %s365_s6  }
 0x15f PF: > { %s389_s5 = sand.u32 1, %s694_s15   ;;  %p936_p9 = scmp.ge.s32.totalorder %s706_s18, 2 }
 0x160   : > { %s390_s20 = scalar_lea.sflag [#allocation4], %s389_s5 }
 0x161   : > { %p501_p10 = pnand %p936_p9, %p793_p12 }
 0x163   : > { %p502_p1 = pneg %p501_p10 }
 0x165   : > { %689 = dma.done.wait (%p502_p1), %s390_s20, 16  }
 0x166   : > { %691 = vsyncadd (%p502_p1), %s390_s20, 4294967280  ;;  %s937_s30 = sld [smem:[#allocation12_spill]]  ;;  %p18_p2 = scmp.ge.s32.totalorder %s762_s21, 4  }
 0x167   : > { %s938_s15 = smov %s698_s16  ;;  %s939_s16 = smov %s702_s17 }
 0x168   : > { %s941_s18 = smov %s762_s21  ;;  %20 = sbr.rel (!%p18_p2) target bundleno = 9 (0x9), region = 89 }
 0x16c   : > { %s940_s17 = smov %s937_s30 }
 0x16d   :  { %395 = vsyncpa [#allocation3], 1 }
 0x16e   :  { %397 = vsyncpa [#allocation3 + $0x1], 1 }
 0x16f   :  { %398 = vsyncpa [#allocation6], 1 }
 0x170   :  { %399 = vsyncpa [#allocation4], 1 }
 0x171   :  { %401 = vsyncpa [#allocation4 + $0x1], 1 }

</bundles_post_ra>
